<compile_context>
chip_gen: v6e
topology: v6e:2x2x1
jax: 0.10.0
libtpu: 0.0.40
codegen_flags: <defaults>
</compile_context>

<pallas_src>
import jax
import jax.numpy as jnp
from jax.experimental import pallas as pl
from jax.experimental.pallas import tpu as pltpu


def coord_attention_kernel(x_ref, ph_ref, pw_ref, eh_ref, ew_ref,
                           w1_ref, b1_ref, w2_ref, b2_ref, w3_ref, b3_ref,
                           o_ref):
    # x_ref block: (NB, C, H*W) -- lane-dense.
    ph = ph_ref[...]          # (HW, H)  mean-over-W pooling matrix
    pw = pw_ref[...]          # (HW, W)  mean-over-H pooling matrix
    eh = eh_ref[...]          # (H, HW)  broadcast each h across its W lanes
    ew = ew_ref[...]          # (W, HW)  broadcast each w across its H rows
    w1 = w1_ref[...]          # (T, C)   conv1 weight (BatchNorm pre-fused)
    b1 = b1_ref[...]          # (T, 1)
    w2 = w2_ref[...]          # (C, T)
    b2 = b2_ref[...]          # (C, 1)
    w3 = w3_ref[...]          # (C, T)
    b3 = b3_ref[...]          # (C, 1)

    nb = x_ref.shape[0]
    for b in range(nb):       # NB is small & static -> unrolled
        xb = x_ref[b].astype(jnp.float32)                            # (C, HW)

        # AdaptiveAvgPool2d((None,1)) / ((1,None)) as lane-dense MXU matmuls.
        x_h = jnp.dot(xb, ph, preferred_element_type=jnp.float32)    # (C, H)
        x_w = jnp.dot(xb, pw, preferred_element_type=jnp.float32)    # (C, W)

        # conv1 (1x1, BN fused) + h_swish, applied to both pooled maps
        # (same weights as the concatenated version; avoids concat/slice).
        yh = jnp.dot(w1, x_h, preferred_element_type=jnp.float32) + b1   # (T, H)
        yw = jnp.dot(w1, x_w, preferred_element_type=jnp.float32) + b1   # (T, W)
        yh = yh * jnp.clip(yh + 3.0, 0.0, 6.0) * (1.0 / 6.0)
        yw = yw * jnp.clip(yw + 3.0, 0.0, 6.0) * (1.0 / 6.0)

        # conv2 / conv3 (1x1) + sigmoid
        oh = jax.nn.sigmoid(
            jnp.dot(w2, yh, preferred_element_type=jnp.float32) + b2)    # (C, H)
        ow = jax.nn.sigmoid(
            jnp.dot(w3, yw, preferred_element_type=jnp.float32) + b3)    # (C, W)

        # Broadcast back to the lane-dense (C, H*W) layout via 0/1 matmuls
        # (equivalent to oh[:, :, None] * ow[:, None, :] reshaped to (C, HW)).
        oh_full = jnp.dot(oh, eh, preferred_element_type=jnp.float32)    # (C, HW)
        ow_full = jnp.dot(ow, ew, preferred_element_type=jnp.float32)    # (C, HW)

        # short * out_w * out_h, explicit cast to the output dtype.
        o_ref[b] = (xb * oh_full * ow_full).astype(o_ref.dtype)


def coord_attention(x, w1, b1, bn_scale, bn_bias, w2, b2, w3, b3,
                    *, vmem_block_budget_bytes=12 * 1024 * 1024):
    N, C, H, W = x.shape
    HW = H * W
    T = w1.shape[0]
    Co = w2.shape[0]
    assert Co == C, "broadcast in `short * out_w * out_h` needs out_channels == in_channels"

    f32 = jnp.float32
    # Fuse BatchNorm (inference: running stats) into conv1 weight/bias.
    # TODO(synk): training-mode BatchNorm (batch statistics) is not implemented in-kernel.
    w1f = (bn_scale * w1).astype(f32)                   # (T, C)
    b1f = (bn_scale * b1 + bn_bias).astype(f32)         # (T, 1)

    # Host-built pooling / broadcast matrices (constant, stay resident in VMEM).
    pos = jnp.arange(HW, dtype=jnp.int32)
    row = pos // W                                      # h index of flat position
    col = pos % W                                       # w index of flat position
    ph = (row[:, None] == jnp.arange(H, dtype=jnp.int32)[None, :]).astype(f32) / W   # (HW, H)
    pw = (col[:, None] == jnp.arange(W, dtype=jnp.int32)[None, :]).astype(f32) / H   # (HW, W)
    eh = (jnp.arange(H, dtype=jnp.int32)[:, None] == row[None, :]).astype(f32)       # (H, HW)
    ew = (jnp.arange(W, dtype=jnp.int32)[:, None] == col[None, :]).astype(f32)       # (W, HW)

    x2 = x.reshape(N, C, HW)                            # free (row-major contiguous)

    # Images per grid step: amortize per-step overhead, fit VMEM (v7x: 64 MiB
    # physical / 32 MiB scoped), and keep >= 2 grid steps when N >= 2 so both
    # v7x TensorCores get work.
    itemsize = x.dtype.itemsize
    per_img = C * HW * (4 * itemsize + 3 * 4)           # 2x dbl-buffered in/out + f32 temps
    nb_cap = max(1, int(vmem_block_budget_bytes // max(per_img, 1)))
    nb_cap = min(nb_cap, 8)                             # bound static unroll
    if N >= 2:
        nb_cap = max(1, min(nb_cap, N // 2))
    nb = 1
    for d in range(1, min(nb_cap, N) + 1):
        if N % d == 0:
            nb = d
    grid = (N // nb,)

    def const_spec(shape):
        nd = len(shape)
        return pl.BlockSpec(shape, lambda n: (0,) * nd)

    flops = N * (4 * C * HW * (H + W) + 4 * T * C * (H + W) + 3 * C * HW)
    cost = pl.CostEstimate(
        flops=int(flops),
        transcendentals=int(N * C * (H + W)),
        bytes_accessed=int(2 * N * C * HW * itemsize),
    )

    out2 = pl.pallas_call(
        coord_attention_kernel,
        out_shape=jax.ShapeDtypeStruct((N, C, HW), x.dtype),
        grid=grid,
        in_specs=[
            pl.BlockSpec((nb, C, HW), lambda n: (n, 0, 0)),   # x (lane-dense)
            const_spec(ph.shape),   # pooling matrix (mean over W)
            const_spec(pw.shape),   # pooling matrix (mean over H)
            const_spec(eh.shape),   # broadcast matrix (H -> HW)
            const_spec(ew.shape),   # broadcast matrix (W -> HW)
            const_spec(w1f.shape),  # conv1 weight (BN fused)
            const_spec(b1f.shape),  # conv1 bias (BN fused)
            const_spec(w2.shape),   # conv2 weight
            const_spec(b2.shape),   # conv2 bias
            const_spec(w3.shape),   # conv3 weight
            const_spec(b3.shape),   # conv3 bias
        ],
        out_specs=pl.BlockSpec((nb, C, HW), lambda n: (n, 0, 0)),
        compiler_params=pltpu.CompilerParams(
            dimension_semantics=("parallel",),
            vmem_limit_bytes=32 * 1024 * 1024,
        ),
        cost_estimate=cost,
    )(x2, ph, pw, eh, ew, w1f, b1f,
      w2.astype(f32), b2.astype(f32), w3.astype(f32), b3.astype(f32))

    return out2.reshape(N, C, H, W)


def coord_attention_ref(x, w1, b1, bn_scale, bn_bias, w2, b2, w3, b3):
    """Pure-JAX reference (mirrors the PyTorch forward, NCHW)."""
    N, C, H, W = x.shape
    x_h = jnp.mean(x, axis=3)                      # (N, C, H)
    x_w = jnp.mean(x, axis=2)                      # (N, C, W)
    cat = jnp.concatenate([x_h, x_w], axis=2)      # (N, C, H+W)
    y = jnp.einsum('tc,nci->nti', w1, cat) + b1[None, :, :]
    y = y * bn_scale[None, :, :] + bn_bias[None, :, :]
    y = y * jnp.clip(y + 3.0, 0.0, 6.0) / 6.0
    yh, yw = y[:, :, :H], y[:, :, H:]
    oh = jax.nn.sigmoid(jnp.einsum('ot,nti->noi', w2, yh) + b2[None, :, :])   # (N, C, H)
    ow = jax.nn.sigmoid(jnp.einsum('ot,nti->noi', w3, yw) + b3[None, :, :])   # (N, C, W)
    return x * ow[:, :, None, :] * oh[:, :, :, None]


if __name__ == "__main__":
    # Module config: in_channels = out_channels = 4, reduction = 32
    #   -> temp_c = max(8, 4 // 32) = 8
    N, C, H, W = 2, 4, 16, 16
    Cout = C
    T = max(8, C // 32)
    eps = 1e-5

    key = jax.random.PRNGKey(0)
    ks = jax.random.split(key, 10)

    x = jax.random.normal(ks[0], (N, C, H, W), dtype=jnp.float32)

    # conv1: (T, C, 1, 1) 1x1 conv -> (T, C) matmul weight
    w1 = 0.1 * jax.random.normal(ks[1], (T, C), dtype=jnp.float32)
    b1 = 0.1 * jax.random.normal(ks[2], (T, 1), dtype=jnp.float32)

    # BatchNorm2d(T): deterministic (inference-mode) params / running stats
    gamma = 1.0 + 0.05 * jax.random.normal(ks[3], (T,), dtype=jnp.float32)
    beta = 0.05 * jax.random.normal(ks[4], (T,), dtype=jnp.float32)
    run_mean = 0.05 * jax.random.normal(ks[5], (T,), dtype=jnp.float32)
    run_var = jnp.abs(1.0 + 0.05 * jax.random.normal(ks[6], (T,), dtype=jnp.float32))
    bn_scale = (gamma / jnp.sqrt(run_var + eps)).reshape(T, 1)
    bn_bias = (beta - run_mean * gamma / jnp.sqrt(run_var + eps)).reshape(T, 1)

    # conv2 / conv3: (Cout, T, 1, 1) 1x1 convs -> (Cout, T) matmul weights
    w2 = 0.1 * jax.random.normal(ks[7], (Cout, T), dtype=jnp.float32)
    b2 = 0.1 * jax.random.normal(ks[8], (Cout, 1), dtype=jnp.float32)
    w3 = 0.1 * jax.random.normal(ks[9], (Cout, T), dtype=jnp.float32)
    b3 = 0.1 * jax.random.normal(jax.random.fold_in(key, 99), (Cout, 1), dtype=jnp.float32)

    out = coord_attention(x, w1, b1, bn_scale, bn_bias, w2, b2, w3, b3)
    out = jax.block_until_ready(out)

    ref = coord_attention_ref(x, w1, b1, bn_scale, bn_bias, w2, b2, w3, b3)
    assert out.shape == (N, C, H, W)
    assert out.dtype == x.dtype
    # Tolerance sized for DEFAULT-precision f32 MXU passes (pooling/broadcast
    # are matmuls in the kernel but exact means/broadcasts in the reference);
    # structural/indexing bugs would produce O(1) errors.
    assert jnp.allclose(out, ref, atol=2e-2, rtol=2e-2), "mismatch vs pure-JAX reference"

    print("KERNEL_OK")
</pallas_src>

<mosaic_0001>
module attributes {stable_mosaic.version = 11 : i64} {
  func.func @coord_attention_kernel(%arg0: i32, %arg1: memref<1x4x256xf32, #tpu.memory_space<vmem>>, %arg2: memref<256x16xf32, #tpu.memory_space<vmem>>, %arg3: memref<256x16xf32, #tpu.memory_space<vmem>>, %arg4: memref<16x256xf32, #tpu.memory_space<vmem>>, %arg5: memref<16x256xf32, #tpu.memory_space<vmem>>, %arg6: memref<8x4xf32, #tpu.memory_space<vmem>>, %arg7: memref<8x1xf32, #tpu.memory_space<vmem>>, %arg8: memref<4x8xf32, #tpu.memory_space<vmem>>, %arg9: memref<4x1xf32, #tpu.memory_space<vmem>>, %arg10: memref<4x8xf32, #tpu.memory_space<vmem>>, %arg11: memref<4x1xf32, #tpu.memory_space<vmem>>, %arg12: memref<1x4x256xf32, #tpu.memory_space<vmem>>) attributes {dimension_semantics = [#tpu.dimension_semantics<parallel>], iteration_bounds = array<i64: 2>, scalar_prefetch = 0 : i64, scratch_operands = 0 : i64, tpu.core_type = #tpu.core_type<tc>, window_params = [{transform_indices = @transform_0, window_bounds = array<i64: 1, 4, 256>}, {pipeline_mode = #tpu.pipeline_mode<synchronous>, transform_indices = @transform_1, window_bounds = array<i64: 256, 16>}, {pipeline_mode = #tpu.pipeline_mode<synchronous>, transform_indices = @transform_2, window_bounds = array<i64: 256, 16>}, {pipeline_mode = #tpu.pipeline_mode<synchronous>, transform_indices = @transform_3, window_bounds = array<i64: 16, 256>}, {pipeline_mode = #tpu.pipeline_mode<synchronous>, transform_indices = @transform_4, window_bounds = array<i64: 16, 256>}, {pipeline_mode = #tpu.pipeline_mode<synchronous>, transform_indices = @transform_5, window_bounds = array<i64: 8, 4>}, {pipeline_mode = #tpu.pipeline_mode<synchronous>, transform_indices = @transform_6, window_bounds = array<i64: 8, 1>}, {pipeline_mode = #tpu.pipeline_mode<synchronous>, transform_indices = @transform_7, window_bounds = array<i64: 4, 8>}, {pipeline_mode = #tpu.pipeline_mode<synchronous>, transform_indices = @transform_8, window_bounds = array<i64: 4, 1>}, {pipeline_mode = #tpu.pipeline_mode<synchronous>, transform_indices = @transform_9, window_bounds = array<i64: 4, 8>}, {pipeline_mode = #tpu.pipeline_mode<synchronous>, transform_indices = @transform_10, window_bounds = array<i64: 4, 1>}, {transform_indices = @transform_11, window_bounds = array<i64: 1, 4, 256>}]} {
    %c0 = arith.constant 0 : index
    %c0_0 = arith.constant 0 : index
    %0 = vector.load %arg2[%c0, %c0_0] : memref<256x16xf32, #tpu.memory_space<vmem>>, vector<256x16xf32>
    %c0_1 = arith.constant 0 : index
    %c0_2 = arith.constant 0 : index
    %1 = vector.load %arg3[%c0_1, %c0_2] : memref<256x16xf32, #tpu.memory_space<vmem>>, vector<256x16xf32>
    %c0_3 = arith.constant 0 : index
    %c0_4 = arith.constant 0 : index
    %2 = vector.load %arg4[%c0_3, %c0_4] : memref<16x256xf32, #tpu.memory_space<vmem>>, vector<16x256xf32>
    %c0_5 = arith.constant 0 : index
    %c0_6 = arith.constant 0 : index
    %3 = vector.load %arg5[%c0_5, %c0_6] : memref<16x256xf32, #tpu.memory_space<vmem>>, vector<16x256xf32>
    %c0_7 = arith.constant 0 : index
    %c0_8 = arith.constant 0 : index
    %4 = vector.load %arg6[%c0_7, %c0_8] : memref<8x4xf32, #tpu.memory_space<vmem>>, vector<8x4xf32>
    %c0_9 = arith.constant 0 : index
    %c0_10 = arith.constant 0 : index
    %5 = vector.load %arg7[%c0_9, %c0_10] : memref<8x1xf32, #tpu.memory_space<vmem>>, vector<8x1xf32>
    %c0_11 = arith.constant 0 : index
    %c0_12 = arith.constant 0 : index
    %6 = vector.load %arg8[%c0_11, %c0_12] : memref<4x8xf32, #tpu.memory_space<vmem>>, vector<4x8xf32>
    %c0_13 = arith.constant 0 : index
    %c0_14 = arith.constant 0 : index
    %7 = vector.load %arg9[%c0_13, %c0_14] : memref<4x1xf32, #tpu.memory_space<vmem>>, vector<4x1xf32>
    %c0_15 = arith.constant 0 : index
    %c0_16 = arith.constant 0 : index
    %8 = vector.load %arg10[%c0_15, %c0_16] : memref<4x8xf32, #tpu.memory_space<vmem>>, vector<4x8xf32>
    %c0_17 = arith.constant 0 : index
    %c0_18 = arith.constant 0 : index
    %9 = vector.load %arg11[%c0_17, %c0_18] : memref<4x1xf32, #tpu.memory_space<vmem>>, vector<4x1xf32>
    %c0_19 = arith.constant 0 : index
    %c0_20 = arith.constant 0 : index
    %c0_21 = arith.constant 0 : index
    %10 = vector.load %arg1[%c0_19, %c0_20, %c0_21] : memref<1x4x256xf32, #tpu.memory_space<vmem>>, vector<1x4x256xf32>
    %11 = vector.shape_cast %10 : vector<1x4x256xf32> to vector<4x256xf32>
    %cst = arith.constant dense<0.000000e+00> : vector<4x16xf32>
    %12 = tpu.matmul %11, %0, %cst {dimension_numbers = #tpu.dot_dimension_numbers<[1], [0], [0], [1], [0, 0, 1, 1], [], []>} : vector<4x256xf32>, vector<256x16xf32>, vector<4x16xf32> -> vector<4x16xf32>
    %cst_22 = arith.constant dense<0.000000e+00> : vector<4x16xf32>
    %13 = tpu.matmul %11, %1, %cst_22 {dimension_numbers = #tpu.dot_dimension_numbers<[1], [0], [0], [1], [0, 0, 1, 1], [], []>} : vector<4x256xf32>, vector<256x16xf32>, vector<4x16xf32> -> vector<4x16xf32>
    %cst_23 = arith.constant dense<0.000000e+00> : vector<8x16xf32>
    %14 = tpu.matmul %4, %12, %cst_23 {dimension_numbers = #tpu.dot_dimension_numbers<[1], [0], [0], [1], [0, 0, 1, 1], [], []>} : vector<8x4xf32>, vector<4x16xf32>, vector<8x16xf32> -> vector<8x16xf32>
    %15 = vector.broadcast %5 : vector<8x1xf32> to vector<8x16xf32>
    %16 = arith.addf %14, %15 : vector<8x16xf32>
    %cst_24 = arith.constant dense<0.000000e+00> : vector<8x16xf32>
    %17 = tpu.matmul %4, %13, %cst_24 {dimension_numbers = #tpu.dot_dimension_numbers<[1], [0], [0], [1], [0, 0, 1, 1], [], []>} : vector<8x4xf32>, vector<4x16xf32>, vector<8x16xf32> -> vector<8x16xf32>
    %18 = vector.broadcast %5 : vector<8x1xf32> to vector<8x16xf32>
    %19 = arith.addf %17, %18 : vector<8x16xf32>
    %cst_25 = arith.constant 3.000000e+00 : f32
    %20 = vector.broadcast %cst_25 : f32 to vector<8x16xf32>
    %21 = arith.addf %16, %20 : vector<8x16xf32>
    %cst_26 = arith.constant 0.000000e+00 : f32
    %cst_27 = arith.constant 6.000000e+00 : f32
    %22 = vector.broadcast %cst_26 : f32 to vector<8x16xf32>
    %23 = arith.maximumf %22, %21 : vector<8x16xf32>
    %24 = vector.broadcast %cst_27 : f32 to vector<8x16xf32>
    %25 = arith.minimumf %24, %23 : vector<8x16xf32>
    %26 = arith.mulf %16, %25 : vector<8x16xf32>
    %cst_28 = arith.constant 0.166666672 : f32
    %27 = vector.broadcast %cst_28 : f32 to vector<8x16xf32>
    %28 = arith.mulf %26, %27 : vector<8x16xf32>
    %cst_29 = arith.constant 3.000000e+00 : f32
    %29 = vector.broadcast %cst_29 : f32 to vector<8x16xf32>
    %30 = arith.addf %19, %29 : vector<8x16xf32>
    %cst_30 = arith.constant 0.000000e+00 : f32
    %cst_31 = arith.constant 6.000000e+00 : f32
    %31 = vector.broadcast %cst_30 : f32 to vector<8x16xf32>
    %32 = arith.maximumf %31, %30 : vector<8x16xf32>
    %33 = vector.broadcast %cst_31 : f32 to vector<8x16xf32>
    %34 = arith.minimumf %33, %32 : vector<8x16xf32>
    %35 = arith.mulf %19, %34 : vector<8x16xf32>
    %cst_32 = arith.constant 0.166666672 : f32
    %36 = vector.broadcast %cst_32 : f32 to vector<8x16xf32>
    %37 = arith.mulf %35, %36 : vector<8x16xf32>
    %cst_33 = arith.constant dense<0.000000e+00> : vector<4x16xf32>
    %38 = tpu.matmul %6, %28, %cst_33 {dimension_numbers = #tpu.dot_dimension_numbers<[1], [0], [0], [1], [0, 0, 1, 1], [], []>} : vector<4x8xf32>, vector<8x16xf32>, vector<4x16xf32> -> vector<4x16xf32>
    %39 = vector.broadcast %7 : vector<4x1xf32> to vector<4x16xf32>
    %40 = arith.addf %38, %39 : vector<4x16xf32>
    %41 = arith.negf %40 : vector<4x16xf32>
    %42 = math.exp %41 : vector<4x16xf32>
    %cst_34 = arith.constant 1.000000e+00 : f32
    %43 = vector.broadcast %cst_34 : f32 to vector<4x16xf32>
    %44 = arith.addf %43, %42 : vector<4x16xf32>
    %45 = arith.divf %43, %44 : vector<4x16xf32>
    %cst_35 = arith.constant dense<0.000000e+00> : vector<4x16xf32>
    %46 = tpu.matmul %8, %37, %cst_35 {dimension_numbers = #tpu.dot_dimension_numbers<[1], [0], [0], [1], [0, 0, 1, 1], [], []>} : vector<4x8xf32>, vector<8x16xf32>, vector<4x16xf32> -> vector<4x16xf32>
    %47 = vector.broadcast %9 : vector<4x1xf32> to vector<4x16xf32>
    %48 = arith.addf %46, %47 : vector<4x16xf32>
    %49 = arith.negf %48 : vector<4x16xf32>
    %50 = math.exp %49 : vector<4x16xf32>
    %cst_36 = arith.constant 1.000000e+00 : f32
    %51 = vector.broadcast %cst_36 : f32 to vector<4x16xf32>
    %52 = arith.addf %51, %50 : vector<4x16xf32>
    %53 = arith.divf %51, %52 : vector<4x16xf32>
    %cst_37 = arith.constant dense<0.000000e+00> : vector<4x256xf32>
    %54 = tpu.matmul %45, %2, %cst_37 {dimension_numbers = #tpu.dot_dimension_numbers<[1], [0], [0], [1], [0, 0, 1, 1], [], []>} : vector<4x16xf32>, vector<16x256xf32>, vector<4x256xf32> -> vector<4x256xf32>
    %cst_38 = arith.constant dense<0.000000e+00> : vector<4x256xf32>
    %55 = tpu.matmul %53, %3, %cst_38 {dimension_numbers = #tpu.dot_dimension_numbers<[1], [0], [0], [1], [0, 0, 1, 1], [], []>} : vector<4x16xf32>, vector<16x256xf32>, vector<4x256xf32> -> vector<4x256xf32>
    %56 = arith.mulf %11, %54 : vector<4x256xf32>
    %57 = arith.mulf %56, %55 : vector<4x256xf32>
    %c0_39 = arith.constant 0 : index
    %c0_40 = arith.constant 0 : index
    %c0_41 = arith.constant 0 : index
    %58 = vector.load %arg12[%c0_39, %c0_40, %c0_41] : memref<1x4x256xf32, #tpu.memory_space<vmem>>, vector<1x4x256xf32>
    %59 = vector.shape_cast %58 : vector<1x4x256xf32> to vector<4x256xf32>
    %60 = vector.shape_cast %57 : vector<4x256xf32> to vector<1x4x256xf32>
    tpu.vector_store %arg12[%c0_39, %c0_40, %c0_41], %60 {strides = array<i32>} : memref<1x4x256xf32, #tpu.memory_space<vmem>>, vector<1x4x256xf32>,
    return
  }
  func.func @transform_0(%arg0: i32) -> (i32, i32, i32) {
    %c0_i32 = arith.constant 0 : i32
    %c0_i32_0 = arith.constant 0 : i32
    %c0_i32_1 = arith.constant 0 : i32
    return %arg0, %c0_i32, %c0_i32_0 : i32, i32, i32
  }
  func.func @transform_1(%arg0: i32) -> (i32, i32) {
    %c0_i32 = arith.constant 0 : i32
    %c0_i32_0 = arith.constant 0 : i32
    %c0_i32_1 = arith.constant 0 : i32
    return %c0_i32, %c0_i32_0 : i32, i32
  }
  func.func @transform_2(%arg0: i32) -> (i32, i32) {
    %c0_i32 = arith.constant 0 : i32
    %c0_i32_0 = arith.constant 0 : i32
    %c0_i32_1 = arith.constant 0 : i32
    return %c0_i32, %c0_i32_0 : i32, i32
  }
  func.func @transform_3(%arg0: i32) -> (i32, i32) {
    %c0_i32 = arith.constant 0 : i32
    %c0_i32_0 = arith.constant 0 : i32
    %c0_i32_1 = arith.constant 0 : i32
    return %c0_i32, %c0_i32_0 : i32, i32
  }
  func.func @transform_4(%arg0: i32) -> (i32, i32) {
    %c0_i32 = arith.constant 0 : i32
    %c0_i32_0 = arith.constant 0 : i32
    %c0_i32_1 = arith.constant 0 : i32
    return %c0_i32, %c0_i32_0 : i32, i32
  }
  func.func @transform_5(%arg0: i32) -> (i32, i32) {
    %c0_i32 = arith.constant 0 : i32
    %c0_i32_0 = arith.constant 0 : i32
    %c0_i32_1 = arith.constant 0 : i32
    return %c0_i32, %c0_i32_0 : i32, i32
  }
  func.func @transform_6(%arg0: i32) -> (i32, i32) {
    %c0_i32 = arith.constant 0 : i32
    %c0_i32_0 = arith.constant 0 : i32
    %c0_i32_1 = arith.constant 0 : i32
    return %c0_i32, %c0_i32_0 : i32, i32
  }
  func.func @transform_7(%arg0: i32) -> (i32, i32) {
    %c0_i32 = arith.constant 0 : i32
    %c0_i32_0 = arith.constant 0 : i32
    %c0_i32_1 = arith.constant 0 : i32
    return %c0_i32, %c0_i32_0 : i32, i32
  }
  func.func @transform_8(%arg0: i32) -> (i32, i32) {
    %c0_i32 = arith.constant 0 : i32
    %c0_i32_0 = arith.constant 0 : i32
    %c0_i32_1 = arith.constant 0 : i32
    return %c0_i32, %c0_i32_0 : i32, i32
  }
  func.func @transform_9(%arg0: i32) -> (i32, i32) {
    %c0_i32 = arith.constant 0 : i32
    %c0_i32_0 = arith.constant 0 : i32
    %c0_i32_1 = arith.constant 0 : i32
    return %c0_i32, %c0_i32_0 : i32, i32
  }
  func.func @transform_10(%arg0: i32) -> (i32, i32) {
    %c0_i32 = arith.constant 0 : i32
    %c0_i32_0 = arith.constant 0 : i32
    %c0_i32_1 = arith.constant 0 : i32
    return %c0_i32, %c0_i32_0 : i32, i32
  }
  func.func @transform_11(%arg0: i32) -> (i32, i32, i32) {
    %c0_i32 = arith.constant 0 : i32
    %c0_i32_0 = arith.constant 0 : i32
    %c0_i32_1 = arith.constant 0 : i32
    return %arg0, %c0_i32, %c0_i32_0 : i32, i32, i32
  }
}

</mosaic_0001>

<bundles_post_ra>
// kernel: tpu_custom_call.1
= control target key start
LH: loop header
LB: loop body
LE: loop exit
PB: predicated region body
PF: predicated region fallthrough
CT: control target
= control target key end

     0   :  { %16 = vsyncpa [#allocation3], 0  ;;  %s1814_s0 = inlined_call_operand.vmem [shape: f32[2,4,256], index: 0, kind: input, shape index: {}]   ;;  %s1815_s1 = inlined_call_operand.vmem [shape: f32[256,16], index: 1, kind: input, shape index: {}]   ;;  %s1816_s2 = inlined_call_operand.vmem [shape: f32[256,16], index: 2, kind: input, shape index: {}]   ;;  %s1817_s3 = inlined_call_operand.vmem [shape: f32[16,256], index: 3, kind: input, shape index: {}]   ;;  %s1818_s4 = inlined_call_operand.vmem [shape: f32[16,256], index: 4, kind: input, shape index: {}]   ;;  %s1819_s5 = inlined_call_operand.vmem [shape: f32[8,4], index: 5, kind: input, shape index: {}]   ;;  %s1820_s6 = inlined_call_operand.vmem [shape: f32[8,1], index: 6, kind: input, shape index: {}]   ;;  %s1821_s7 = inlined_call_operand.vmem [shape: f32[4,8], index: 7, kind: input, shape index: {}]   ;;  %s1822_s8 = inlined_call_operand.vmem [shape: f32[4,1], index: 8, kind: input, shape index: {}]   ;;  %s1823_s9 = inlined_call_operand.vmem [shape: f32[4,8], index: 9, kind: input, shape index: {}]   ;;  %s1824_s10 = inlined_call_operand.vmem [shape: f32[4,1], index: 10, kind: input, shape index: {}]   ;;  %s1825_s11 = inlined_call_operand.hbm [shape: f32[2,4,256], index: 11, kind: output, shape index: {}]  }
   0x1   :  { %18 = vsyncpa [#allocation3 + $0x1], 0  ;;  %s1477_s17 = smov 0   ;;  %s1479_s18 = smov 0  }
   0x2   :  { %s1481_s19 = smov 0   ;;  %s1483_s20 = smov 0  }
   0x3 LB: > { %1827 = sst [smem:[#allocation5_spill]] %s1407_s19  ;;  %s1498_s21 = sadd.s32 4294967295, %s1411_s20   ;;  %s1411_s20 = sphi %s1483_s20, %s1835_s20   ;;  %s1407_s19 = sphi %s1481_s19, %s1832_s19   ;;  %s1403_s18 = sphi %s1479_s18, %s1834_s18   ;;  %s1399_s17 = sphi %s1477_s17, %s1833_s17  }
   0x4   : > { %s1176_s22 = sadd.s32 4294967294, %s1411_s20   ;;  %s1502_s23 = sadd.s32 1, %s1411_s20  }
   0x5   : > { %s267_s24 = sadd.s32 1, %s1407_s19  ;;  %s264_s25 = ssub.s32 %s1411_s20, %s1502_s23 }
   0x6   : > { %p277_p0 = scmp.ne.s32.totalorder %s1407_s19, %s1403_s18  ;;  %p265_p1 = scmp.eq.s32.totalorder %s264_s25, 0 }
   0x7   : > { %p278_p2 = scmp.eq.s32.totalorder %s1498_s21, 1  ;;  %p283_p3 = scmp.ne.s32.totalorder %s1403_s18, %s1399_s17 }
   0x8   : > { %p284_p4 = scmp.eq.s32.totalorder %s1176_s22, 1  ;;  %p1179_p7 = scmp.ge.s32.totalorder %s1411_s20, 1 }
   0x9   : > { %s1513_s26 = scalar_select %p265_p1, %s1407_s19, %s267_s24  }
   0xa   : > { %p1515_p5 = por %p278_p2, %p277_p0  ;;  %p1519_p6 = por %p284_p4, %p283_p3 }
   0xb   : > { %1828 = sst [smem:[#allocation6_spill]] %s1513_s26  ;;  %p340_p8 = scmp.lt.s32.totalorder %s1411_s20, 3 }
   0xd   : > { %p341_p9 = pnand %p1179_p7, %p340_p8 }
   0xe   : > { %p380_p10 = scmp.lt.s32.totalorder (!%p341_p9), %s1498_s21, 1  ;;  %s1199_s13 = sshll.u32 (!%p341_p9), %s1498_s21, 7 }
   0xf   : > { %344 = sbr.rel (%p341_p9) target bundleno = 900 (0x384), region = 64  ;;  %s1416_s26 = smov (!%p341_p9), [#allocation2]  }
  0x14   : > { %v416_v0 = vld [vmem:[%s1815_s1 + $0xf8] sm:$0xff]  ;;  %v415_v4 = vld [vmem:[%s1815_s1 + $0xf0] sm:$0xff]  ;;  %v414_v8 = vld [vmem:[%s1815_s1 + $0xe8] sm:$0xff]  ;;  %s1637_s12 = scalar_select %p380_p10, %s1498_s21, 1  ;;  %vm1414_vm0 = vmmov 0   ;;  %vm616_vm1 = vcmask 1043456  }
  0x15   : > { %v448_v1 = vld [vmem:[%s1816_s2 + $0xf8] sm:$0xff]  ;;  %1200 = vmatprep.subr.mxu0 %v416_v0  ;;  %v447_v5 = vld [vmem:[%s1816_s2 + $0xf0] sm:$0xff]  ;;  %v446_v9 = vld [vmem:[%s1816_s2 + $0xe8] sm:$0xff]  ;;  %vm612_vm2 = vcmask 31744   ;;  %vm778_vm3 = vcmask 64512   ;;  %vm942_vm4 = vcmask 130048  }
  0x16   : > { %v400_v2 = vld [vmem:[%s1815_s1 + $0x78] sm:$0xff]  ;;  %1235 = vmatprep.subr.mxu1 %v448_v1  ;;  %v399_v6 = vld [vmem:[%s1815_s1 + $0x70] sm:$0xff]  ;;  %v398_v10 = vld [vmem:[%s1815_s1 + $0x68] sm:$0xff]  ;;  %s1198_s25 = sshll.u32 %s1637_s12, 3  ;;  %s1115_s12 = scalar_lea.hbm %s1825_s11, %s1199_s13 }
  0x17   : > { %v432_v3 = vld [vmem:[%s1816_s2 + $0x78] sm:$0xff]  ;;  %1201 = vmatpush3.msra.mxu0 %v400_v2  ;;  %v431_v7 = vld [vmem:[%s1816_s2 + $0x70] sm:$0xff]  ;;  %v430_v11 = vld [vmem:[%s1816_s2 + $0x68] sm:$0xff]  ;;  %s384_s19 = scalar_lea.vmem %s1814_s0, %s1198_s25  ;;  %v1413_v2 = vmov 0.0   ;;  %s1355_s21 = sshll.u32 %s1416_s26, 4  ;;  %s1356_s21 = int_to_ptr.vmem [resolvable:$false] %s1355_s21 }
  0x18   : > { %1236 = vmatpush3.msra.mxu1 %v432_v3  ;;  %1202 = vmatprep.subr.mxu0 %v415_v4  ;;  %v413_v12 = vld [vmem:[%s1815_s1 + $0xe0] sm:$0xff]  ;;  %v412_v16 = vld [vmem:[%s1815_s1 + $0xd8] sm:$0xff]  ;;  %v411_v20 = vld [vmem:[%s1815_s1 + $0xd0] sm:$0xff]  ;;  %v1415_v4 = vmov 0   ;;  %s1357_s25 = scalar_lea.vmem %s1356_s21, 256 }
  0x19   : > { %1237 = vmatprep.subr.mxu1 %v447_v5  ;;  %1203 = vmatpush3.msra.mxu0 %v399_v6  ;;  %v445_v13 = vld [vmem:[%s1816_s2 + $0xe0] sm:$0xff]  ;;  %v444_v17 = vld [vmem:[%s1816_s2 + $0xd8] sm:$0xff]  ;;  %v443_v21 = vld [vmem:[%s1816_s2 + $0xd0] sm:$0xff] }
  0x1a   : > { %1238 = vmatpush3.msra.mxu1 %v431_v7  ;;  %1204 = vmatprep.subr.mxu0 %v414_v8  ;;  %v397_v14 = vld [vmem:[%s1815_s1 + $0x60] sm:$0xff]  ;;  %v396_v18 = vld [vmem:[%s1815_s1 + $0x58] sm:$0xff]  ;;  %v395_v22 = vld [vmem:[%s1815_s1 + $0x50] sm:$0xff] }
  0x1b   : > { %1239 = vmatprep.subr.mxu1 %v446_v9  ;;  %v429_v15 = vld [vmem:[%s1816_s2 + $0x60] sm:$0xff]  ;;  %1205 = vmatpush3.msra.mxu0 %v398_v10  ;;  %v428_v19 = vld [vmem:[%s1816_s2 + $0x58] sm:$0xff]  ;;  %v427_v23 = vld [vmem:[%s1816_s2 + $0x50] sm:$0xff] }
  0x1c   : > { %1240 = vmatpush3.msra.mxu1 %v430_v11  ;;  %1206 = vmatprep.subr.mxu0 %v413_v12  ;;  %v410_v24 = vld [vmem:[%s1815_s1 + $0xc8] sm:$0xff]  ;;  %v409_v28 = vld [vmem:[%s1815_s1 + $0xc0] sm:$0xff]  ;;  %v408_v32 = vld [vmem:[%s1815_s1 + $0xb8] sm:$0xff] }
  0x1d   : > { %1241 = vmatprep.subr.mxu1 %v445_v13  ;;  %1207 = vmatpush3.msra.mxu0 %v397_v14  ;;  %v442_v25 = vld [vmem:[%s1816_s2 + $0xc8] sm:$0xff]  ;;  %v441_v29 = vld [vmem:[%s1816_s2 + $0xc0] sm:$0xff]  ;;  %v440_v33 = vld [vmem:[%s1816_s2 + $0xb8] sm:$0xff] }
  0x1e   : > { %1242 = vmatpush3.msra.mxu1 %v429_v15  ;;  %1208 = vmatprep.subr.mxu0 %v412_v16  ;;  %v394_v26 = vld [vmem:[%s1815_s1 + $0x48] sm:$0xff]  ;;  %v393_v30 = vld [vmem:[%s1815_s1 + $0x40] sm:$0xff]  ;;  %v392_v34 = vld [vmem:[%s1815_s1 + $0x38] sm:$0xff] }
  0x1f   : > { %1243 = vmatprep.subr.mxu1 %v444_v17  ;;  %1209 = vmatpush3.msra.mxu0 %v396_v18  ;;  %v426_v27 = vld [vmem:[%s1816_s2 + $0x48] sm:$0xff]  ;;  %v425_v31 = vld [vmem:[%s1816_s2 + $0x40] sm:$0xff]  ;;  %v424_v35 = vld [vmem:[%s1816_s2 + $0x38] sm:$0xff] }
  0x20   : > { %1244 = vmatpush3.msra.mxu1 %v428_v19  ;;  %1210 = vmatprep.subr.mxu0 %v411_v20  ;;  %v407_v36 = vld [vmem:[%s1815_s1 + $0xb0] sm:$0xff]  ;;  %v406_v40 = vld [vmem:[%s1815_s1 + $0xa8] sm:$0xff]  ;;  %v405_v44 = vld [vmem:[%s1815_s1 + $0xa0] sm:$0xff] }
  0x21   : > { %1245 = vmatprep.subr.mxu1 %v443_v21  ;;  %1211 = vmatpush3.msra.mxu0 %v395_v22  ;;  %v439_v37 = vld [vmem:[%s1816_s2 + $0xb0] sm:$0xff]  ;;  %v438_v41 = vld [vmem:[%s1816_s2 + $0xa8] sm:$0xff]  ;;  %v437_v45 = vld [vmem:[%s1816_s2 + $0xa0] sm:$0xff] }
  0x22   : > { %1246 = vmatpush3.msra.mxu1 %v427_v23  ;;  %1212 = vmatprep.subr.mxu0 %v410_v24  ;;  %v391_v38 = vld [vmem:[%s1815_s1 + $0x30] sm:$0xff]  ;;  %v390_v42 = vld [vmem:[%s1815_s1 + $0x28] sm:$0xff]  ;;  %v389_v46 = vld [vmem:[%s1815_s1 + $0x20] sm:$0xff] }
  0x23   : > { %1247 = vmatprep.subr.mxu1 %v442_v25  ;;  %1213 = vmatpush3.msra.mxu0 %v394_v26  ;;  %v423_v39 = vld [vmem:[%s1816_s2 + $0x30] sm:$0xff]  ;;  %v422_v43 = vld [vmem:[%s1816_s2 + $0x28] sm:$0xff]  ;;  %v421_v47 = vld [vmem:[%s1816_s2 + $0x20] sm:$0xff] }
  0x24   : > { %1248 = vmatpush3.msra.mxu1 %v426_v27  ;;  %1214 = vmatprep.subr.mxu0 %v409_v28  ;;  %v404_v48 = vld [vmem:[%s1815_s1 + $0x98] sm:$0xff]  ;;  %v403_v52 = vld [vmem:[%s1815_s1 + $0x90] sm:$0xff]  ;;  %v1703_v56 = vld [vmem:[%s384_s19] sm:$0xff]  ;;  %s377_s19 = sand.u32 1, %s1403_s18  }
  0x25   : > { %1249 = vmatprep.subr.mxu1 %v441_v29  ;;  %1215 = vmatpush3.msra.mxu0 %v393_v30  ;;  %v436_v49 = vld [vmem:[%s1816_s2 + $0x98] sm:$0xff]  ;;  %v435_v53 = vld [vmem:[%s1816_s2 + $0x90] sm:$0xff]  ;;  %v402_v57 = vld [vmem:[%s1815_s1 + $0x88] sm:$0xff]  ;;  %v465_v63 = vcombine.high %v1703_v56, %v1703_v56  ;;  %s1180_s30 = sshll.u32 %s377_s19, 3  ;;  %s1103_s24 = scalar_lea.sflag [#allocation3], %s377_s19 }
  0x26   : > { %1250 = vmatpush3.msra.mxu1 %v425_v31  ;;  %1216 = vmatprep.subr.mxu0 %v408_v32  ;;  %v388_v50 = vld [vmem:[%s1815_s1 + $0x18] sm:$0xff]  ;;  %v387_v54 = vld [vmem:[%s1815_s1 + $0x10] sm:$0xff]  ;;  %v434_v58 = vld [vmem:[%s1816_s2 + $0x88] sm:$0xff]  ;;  %s379_s14 = scalar_lea.vmem [#allocation2], %s1180_s30 }
  0x27   : > { %1251 = vmatprep.subr.mxu1 %v440_v33  ;;  %1217 = vmatpush3.msra.mxu0 %v392_v34  ;;  %v420_v51 = vld [vmem:[%s1816_s2 + $0x18] sm:$0xff]  ;;  %v419_v55 = vld [vmem:[%s1816_s2 + $0x10] sm:$0xff]  ;;  %v386_v59 = vld [vmem:[%s1815_s1 + $0x8] sm:$0xff]  ;;  %s1117_s15 = sshll.u32 %s379_s14, 4  ;;  %s1118_s15 = int_to_ptr.vmem [resolvable:$true] %s1117_s15 }
  0x28   : > { %1252 = vmatpush3.msra.mxu1 %v424_v35  ;;  %1218 = vmatprep.subr.mxu0 %v407_v36  ;;  %v418_v60 = vld [vmem:[%s1816_s2 + $0x8] sm:$0xff]  ;;  %v401_v61 = vld [vmem:[%s1815_s1 + $0x80] sm:$0xff]  ;;  %v452_v33 = vld [vmem:[%s1817_s3 + $0x18] sm:$0xff]  ;;  %s1351_s29 = scalar_lea.vmem %s1118_s15, 128  ;;  %p1358_p0 = scmp.lt.s32.totalorder %s1118_s15, %s1356_s21 }
  0x29   : > { %1253 = vmatprep.subr.mxu1 %v439_v37  ;;  %1219 = vmatpush3.msra.mxu0 %v391_v38  ;;  %v433_v62 = vld [vmem:[%s1816_s2 + $0x80] sm:$0xff]  ;;  %v451_v34 = vld [vmem:[%s1817_s3 + $0x10] sm:$0xff]  ;;  %v450_v35 = vld [vmem:[%s1817_s3 + $0x8] sm:$0xff]  ;;  %p1352_p11 = scmp.ne.s32.totalorder %s1118_s15, %s1351_s29  ;;  %p1359_p1 = scmp.lt.s32.totalorder %s1357_s25, %s1351_s29 }
  0x2a   : > { %1254 = vmatpush3.msra.mxu1 %v423_v39  ;;  %1220 = vmatprep.subr.mxu0 %v406_v40  ;;  %v385_v0 = vld [vmem:[%s1815_s1] sm:$0xff]  ;;  %v456_v36 = vld [vmem:[%s1818_s4 + $0x18] sm:$0xff]  ;;  %v455_v38 = vld [vmem:[%s1818_s4 + $0x10] sm:$0xff] }
  0x2b   : > { %1255 = vmatprep.subr.mxu1 %v438_v41  ;;  %1221 = vmatpush3.msra.mxu0 %v390_v42  ;;  %v417_v1 = vld [vmem:[%s1816_s2] sm:$0xff]  ;;  %v454_v39 = vld [vmem:[%s1818_s4 + $0x8] sm:$0xff]  ;;  %p1353_p12 = pnand %p1352_p11, %p1515_p5  ;;  %p1360_p2 = por %p1359_p1, %p1358_p0 }
  0x2c   : > { %1256 = vmatpush3.msra.mxu1 %v422_v43  ;;  %1222 = vmatprep.subr.mxu0 %v405_v44  ;;  %v458_v3 = vld [vmem:[%s1820_s6] sm:$0xff] }
  0x2d   : > { %1257 = vmatprep.subr.mxu1 %v437_v45  ;;  %1223 = vmatpush3.msra.mxu0 %v389_v46  ;;  %v460_v5 = vld [vmem:[%s1822_s8] sm:$0xf]  ;;  %p1354_p13 = pneg %p1353_p12 }
  0x2e   : > { %1258 = vmatpush3.msra.mxu1 %v421_v47  ;;  %1224 = vmatprep.subr.mxu0 %v404_v48  ;;  %v457_v12 = vld [vmem:[%s1819_s5] sm:$0xff] }
  0x2f   : > { %1259 = vmatprep.subr.mxu1 %v436_v49  ;;  %1225 = vmatpush3.msra.mxu0 %v388_v50  ;;  %v462_v13 = vld [vmem:[%s1824_s10] sm:$0xf]  ;;  %p1361_p3 = pnand %p1360_p2, %p1354_p13 }
  0x30   : > { %1260 = vmatpush3.msra.mxu1 %v420_v51  ;;  %1226 = vmatprep.subr.mxu0 %v403_v52  ;;  %v459_v29 = vld [vmem:[%s1821_s7] sm:$0xf] }
  0x31   : > { %1261 = vmatprep.subr.mxu1 %v435_v53  ;;  %1227 = vmatpush3.msra.mxu0 %v387_v54  ;;  %v461_v32 = vld [vmem:[%s1823_s9] sm:$0xf] }
  0x32   : > { %1262 = vmatpush3.msra.mxu1 %v419_v55  ;;  %1228 = vmatprep.subr.mxu0 %v402_v57  ;;  %v449_v37 = vld [vmem:[%s1817_s3] sm:$0xff] }
  0x33   : > { %1263 = vmatprep.subr.mxu1 %v434_v58  ;;  %1229 = vmatpush3.msra.mxu0 %v386_v59  ;;  %v453_v40 = vld [vmem:[%s1818_s4] sm:$0xff] }
  0x34   : > { %1264 = vmatpush3.msra.mxu1 %v418_v60  ;;  %1230 = vmatprep.subr.mxu0 %v401_v61 }
  0x35   : > { %1265 = vmatprep.subr.mxu1 %v433_v62  ;;  %1231 = vmatpush3.msra.mxu0 %v385_v0 }
  0x36   : > { %531 = vmatprep.mubr.f32.mxu0 %v465_v63  ;;  %1266 = vmatpush3.msra.mxu1 %v417_v1 }
  0x37   : > { %601 = vmatprep.mubr.f32.mxu1 %v465_v63  ;;  %532 = vmatmul.mubr.f32.vlgmr.msra.gmra.mxu0 %v1703_v56 }
  0x38   : > { %602 = vmatmul.mubr.f32.vlgmr.msra.gmra.mxu1 %v1703_v56  ;;  %1278 = vmatprep.subr.mxu0 %v1413_v2 }
  0x39   : > { %1283 = vmatprep.subr.mxu1 %v1413_v2  ;;  %1280 = vmatprep.mubr.msk.f32.mxu0 %vm1414_vm0, %v1413_v2 }
  0x3a   : > { %1285 = vmatprep.mubr.msk.f32.mxu1 %vm1414_vm0, %v1413_v2  ;;  %1340 = vset.pattern.permute.xlu0 %v1415_v4 }
  0x3b   : > { %1341 = vset.pattern.permute.xlu1 %v1415_v4  ;;  %609 = vperm.xlu0 %1340, %v458_v3  }
  0x3c   : > { %860 = vperm.xlu1 %1341, %v462_v13  }
  0x3f   : > { %775 = vperm.xlu0 %1340, %v460_v5  }
  0xb6   : > { %v610_v14 = vpop.permute.xlu0 %609 }
  0xb7   : > { %v861_v41 = vpop.permute.xlu1 %860 }
  0xba   : > { %v776_v42 = vpop.permute.xlu0 %775 }
  0xf7   : > { %v1232_v6 = vpop.f32.mrf.mxu0 }
  0xf8   : > { %v1267_v7 = vpop.f32.mrf.mxu1 }
  0xf9   : > { %v1233_v8 = vpop.f32.mrf.mxu0 }
  0xfa   : > { %v1268_v9 = vpop.f32.mrf.mxu1  ;;  %v1234_v10 = vadd.f32 %v1233_v8, %v1232_v6 }
  0xfb   : > { %v1269_v11 = vadd.f32 %v1268_v9, %v1267_v7 }
  0xfc   : > { %1279 = vmatpush3.msk.msra.mxu0 %vm616_vm1, %v1234_v10 }
  0xfd   : > { %1284 = vmatpush3.msk.msra.mxu1 %vm616_vm1, %v1269_v11  ;;  %1281 = vmatmul.mubr.msk.f32.vlgmr.msra.gmra.mxu0 %vm612_vm2, %v457_v12 }
  0xfe   : > { %1286 = vmatmul.mubr.msk.f32.vlgmr.msra.gmra.mxu1 %vm612_vm2, %v457_v12  ;;  %1288 = vmatprep.subr.mxu0 %v1413_v2 }
  0xff   : > { %1293 = vmatprep.subr.mxu1 %v1413_v2  ;;  %1290 = vmatprep.mubr.msk.f32.mxu0 %vm1414_vm0, %v1413_v2 }
 0x100   : > { %1295 = vmatprep.mubr.msk.f32.mxu1 %vm1414_vm0, %v1413_v2 }
 0x1bd   : > { %v686_v15 = vpop.f32.mrf.mxu0 }
 0x1be   : > { %v759_v16 = vpop.f32.mrf.mxu1  ;;  %v687_v17 = vadd.f32 %v686_v15, %v610_v14 }
 0x1bf   : > { %v760_v18 = vadd.f32 %v759_v16, %v610_v14  ;;  %v1282_v19 = vpop.f32.mrf.mxu0 }
 0x1c0   : > { %v1287_v20 = vpop.f32.mrf.mxu1  ;;  %v763_v21 = vadd.f32 3.0, %v687_v17 }
 0x1c1   : > { %v768_v22 = vadd.f32 3.0, %v760_v18 }
 0x1c2   : > { %v764_v23 = vmax.f32 %v763_v21, 0.0 }
 0x1c3   : > { %v769_v24 = vmax.f32 %v768_v22, 0.0 }
 0x1c4   : > { %v765_v25 = vmin.f32 %v764_v23, 6.0 }
 0x1c5   : > { %v770_v26 = vmin.f32 %v769_v24, 6.0 }
 0x1c6   : > { %v766_v27 = vmul.f32 %v765_v25, %v687_v17 }
 0x1c7   : > { %v771_v28 = vmul.f32 %v770_v26, %v760_v18 }
 0x1c8   : > { %v767_v30 = vmul.f32 0.16666667, %v766_v27 }
 0x1c9   : > { %v772_v31 = vmul.f32 0.16666667, %v771_v28 }
 0x1ca   : > { %1289 = vmatpush3.msra.mxu0 %v767_v30 }
 0x1cb   : > { %1294 = vmatpush3.msra.mxu1 %v772_v31  ;;  %1291 = vmatmul.mubr.msk.f32.vlgmr.msra.gmra.mxu0 %vm778_vm3, %v459_v29 }
 0x1cc   : > { %1296 = vmatmul.mubr.msk.f32.vlgmr.msra.gmra.mxu1 %vm778_vm3, %v461_v32  ;;  %1010 = vmatprep.mubr.f32.mxu0 %v1413_v2 }
 0x1cd   : > { %1084 = vmatprep.mubr.f32.mxu1 %v1413_v2  ;;  %974 = vmatprep.subr.mxu0 %v452_v33 }
 0x1ce   : > { %975 = vmatpush1.msra.mxu0 %v451_v34  ;;  %1048 = vmatprep.subr.mxu1 %v456_v36 }
 0x1cf   : > { %976 = vmatprep.subr.mxu0 %v450_v35  ;;  %1049 = vmatpush1.msra.mxu1 %v455_v38 }
 0x1d0   : > { %977 = vmatpush1.msra.mxu0 %v449_v37  ;;  %1050 = vmatprep.subr.mxu1 %v454_v39 }
 0x1d1   : > { %1051 = vmatpush1.msra.mxu1 %v453_v40 }
 0x28b   : > { %v848_v43 = vpop.f32.mrf.mxu0 }
 0x28c   : > { %v932_v44 = vpop.f32.mrf.mxu1  ;;  %v849_v45 = vadd.f32 %v848_v43, %v776_v42 }
 0x28d   : > { %v933_v46 = vadd.f32 %v932_v44, %v861_v41  ;;  %v1292_v47 = vpop.f32.mrf.mxu0 }
 0x28e   : > { %v1297_v48 = vpop.f32.mrf.mxu1  ;;  %v1188_v49 = vmul.f32 -1.442695, %v849_v45 }
 0x28f   : > { %v1190_v50 = vmul.f32 -1.442695, %v933_v46 }
 0x290   : > { %1343 = vpow2.f32 %v1188_v49 }
 0x291   : > { %1345 = vpow2.f32 %v1190_v50 }
 0x29d   : > { %v1344_v51 = vpop.eup %1343 }
 0x29e   : > { %v1346_v52 = vpop.eup %1345  ;;  %v855_v53 = vadd.f32 1.0, %v1344_v51 }
 0x29f   : > { %v939_v54 = vadd.f32 1.0, %v1346_v52 }
 0x2a0   : > { %1347 = vrcp.f32 %v855_v53 }
 0x2a1   : > { %1349 = vrcp.f32 %v939_v54 }
 0x2ad   : > { %v1348_v55 = vpop.eup %1347 }
 0x2ae   : > { %v1350_v57 = vpop.eup %1349  ;;  %1191 = vmatmul.mubr.msk.f32.vlgmr.msra.gmra.mxu0 %vm942_vm4, %v1348_v55 }
 0x2af   : > { %1192 = vmatmul.mubr.msk.f32.vlgmr.msra.gmra.mxu1 %vm942_vm4, %v1350_v57 }
 0x36e   : > { %v1012_v58 = vpop.f32.mrf.mxu0 }
 0x36f   : > { %v1086_v59 = vpop.f32.mrf.mxu1 }
 0x370   : > { %v1014_v60 = vpop.f32.mrf.mxu0 }
 0x371   : > { %v1093_v61 = vcombine.low %v1012_v58, %v1014_v60  ;;  %v1088_v62 = vpop.f32.mrf.mxu1 }
 0x372   : > { %v1098_v0 = vcombine.low %v1086_v59, %v1088_v62 }
 0x373   : > { %v1095_v63 = vmul.f32 %v1093_v61, %v1703_v56 }
 0x375   : > { %v1100_v1 = vmul.f32 %v1098_v0, %v1095_v63 }
 0x377   : > { %1101 = vst [vmem:[%s379_s14] sm:$0xff] %v1100_v1 }
 0x378   : > { %1364 = shalt.err (!%p1361_p3)
}
 0x379   : > { %s1365_s30 = scalar_lea.hbm %s1115_s12, 128  ;;  %s1369_s14 = scalar_lea.hbm %s1825_s11, 256 }
 0x37a   : > { %p1366_p4 = scmp.ne.s32.totalorder %s1115_s12, %s1365_s30  ;;  %p1370_p9 = scmp.lt.s32.totalorder %s1115_s12, %s1825_s11 }
 0x37b   : > { %p1371_p10 = scmp.lt.s32.totalorder %s1369_s14, %s1365_s30 }
 0x37c   : > { %p1367_p7 = pnand %p1366_p4, %p1515_p5 }
 0x37d   : > { %p1372_p11 = por %p1371_p10, %p1370_p9 }
 0x37e   : > { %p1368_p8 = pneg %p1367_p7 }
 0x380   : > { %p1373_p12 = pnand %p1372_p11, %p1368_p8 }
 0x382   : > { %1376 = shalt.err (!%p1373_p12)
}
 0x383   : > { %1298 = dma.vmem_to_hbm [thread:$0]  (%p1515_p5), %s1118_s15, 128, %s1115_s12, %s1103_s24  }
 0x384 PF: > { %p1304_p13 = scmp.ge.s32.totalorder %s1411_s20, 2  ;;  %s1129_s29 = sand.u32 1, %s1399_s17  }
 0x385   : > { %s1130_s26 = scalar_lea.sflag [#allocation3], %s1129_s29 }
 0x386   : > { %p1301_p0 = pnand %p1304_p13, %p1519_p6 }
 0x388   : > { %p1302_p1 = pneg %p1301_p0 }
 0x38a   : > { %1394 = dma.done.wait (%p1302_p1), %s1130_s26, 128  }
 0x38b   : > { %1396 = vsyncadd (%p1302_p1), %s1130_s26, 4294967168  ;;  %s1831_s21 = sld [smem:[#allocation5_spill]]  ;;  %p21_p2 = scmp.ge.s32.totalorder %s1502_s23, 4  }
 0x38c   : > { %s1832_s19 = sld [smem:[#allocation6_spill]]  ;;  %s1833_s17 = smov %s1403_s18 }
 0x38d   : > { %s1835_s20 = smov %s1502_s23  ;;  %23 = sbr.rel (!%p21_p2) target bundleno = 3 (0x3), region = 99 }
 0x391   : > { %s1834_s18 = smov %s1831_s21 }
 0x392   :  { %1135 = vsyncpa [#allocation3], 1 }
 0x393   :  { %1137 = vsyncpa [#allocation3 + $0x1], 1 }

</bundles_post_ra>
